<compile_context>
chip_gen: v6e
topology: v6e:2x2x1
jax: 0.10.0
libtpu: 0.0.40
codegen_flags: <defaults>
</compile_context>

<pallas_src>
import functools

import jax
import jax.numpy as jnp
from jax.experimental import pallas as pl
from jax.experimental.pallas import tpu as pltpu


H1 = 256   # fc1 width (hard-coded in the PyTorch module)
H2 = 128   # fc_mu / fc_sigma width (hard-coded in the PyTorch module)


def _prelu(x, a):
    # PReLU with a single learnable slope (PyTorch default num_parameters=1).
    return jnp.where(x > 0, x, a * x)


def _policy_kernel(
    x_ref,
    w1_ref, b1_ref, a1_ref,
    wcat_ref, bcat_ref, amu_ref,
    wout_ref, bout_ref, ar_ref,
    out_ref,
    *, out_size,
):
    cdt = w1_ref.dtype  # MXU operand dtype (f32 or bf16); accumulate in f32.

    # ---- fc1 + PReLU ------------------------------------------------------
    h = jnp.dot(x_ref[...], w1_ref[...], preferred_element_type=jnp.float32)
    h = _prelu(h + b1_ref[...], a1_ref[0, 0])                       # (TB, 256)

    # ---- fused mid layer: [fc_mu | fc_sigma] in one N=256 matmul ----------
    h2 = jnp.dot(h.astype(cdt), wcat_ref[...],
                 preferred_element_type=jnp.float32) + bcat_ref[...]  # (TB, 256)
    hmu = _prelu(h2[:, :H2], amu_ref[0, 0])        # PReLU on lanes 0:128
    hsg = jnp.tanh(h2[:, H2:])                     # tanh  on lanes 128:256
    h3 = jnp.concatenate([hmu, hsg], axis=1)       # (TB, 256), lane-aligned

    # ---- fused output heads: block-diag [[Wmu2,0],[0,Wsg2]], lane-dense ---
    z = jnp.dot(h3.astype(cdt), wout_ref[...],
                preferred_element_type=jnp.float32) + bout_ref[...]   # (TB, N_pad)

    # mu columns [0:out): tanh(z) * action_range ; sigma columns [out:2*out): exp(z)
    col = jax.lax.broadcasted_iota(jnp.int32, z.shape, 1)
    out_ref[...] = jnp.where(col < out_size, jnp.tanh(z) * ar_ref[...], jnp.exp(z))


def fuse_params(p, out_size, compute_dtype=jnp.float32):
    """Build the fused / padded parameter set consumed by the Pallas kernel."""
    n_pad = max(128, ((2 * out_size + 127) // 128) * 128)

    wcat = jnp.concatenate([p["wmu1"], p["wsg1"]], axis=1)           # (256, 256)
    bcat = jnp.concatenate([p["bmu1"], p["bsg1"]], axis=1)           # (1, 256)

    wout = jnp.zeros((H1, n_pad), jnp.float32)
    wout = wout.at[:H2, :out_size].set(p["wmu2"])
    wout = wout.at[H2:, out_size:2 * out_size].set(p["wsg2"])
    bout = jnp.zeros((1, n_pad), jnp.float32)
    bout = bout.at[:, :out_size].set(p["bmu2"])
    bout = bout.at[:, out_size:2 * out_size].set(p["bsg2"])

    arange = jnp.zeros((1, n_pad), jnp.float32)
    arange = arange.at[:, :out_size].set(p["action_range"])

    return {
        "w1": p["w1"].astype(compute_dtype),
        "b1": p["b1"],
        "a1": p["a1"],
        "wcat": wcat.astype(compute_dtype),
        "bcat": bcat,
        "amu": p["amu"],
        "wout": wout.astype(compute_dtype),
        "bout": bout,
        "arange": arange,
        "out_size": int(out_size),
        "n_pad": int(n_pad),
    }


def policy_continuous_forward(x, fp, *, block_b=256):
    """x: (B, input_size) float32.  Returns (mu, sigma), each (B, out_size) f32."""
    B, in_size = x.shape
    out_size = fp["out_size"]
    n_pad = fp["n_pad"]
    cdt = fp["w1"].dtype

    # Batch tiling: pad B to a multiple of the (8-aligned) tile size.
    b8 = max(8, ((B + 7) // 8) * 8)
    tb = max(8, (min(block_b, b8) // 8) * 8)
    b_pad = ((b8 + tb - 1) // tb) * tb
    xp = x
    if b_pad != B:
        xp = jnp.zeros((b_pad, in_size), x.dtype).at[:B].set(x)
    xp = xp.astype(cdt)

    grid = (b_pad // tb,)

    def resident(arr):  # full-array block, same index every step -> stays in VMEM
        return pl.BlockSpec(arr.shape, lambda i: (0, 0))

    smem_scalar = pl.BlockSpec(memory_space=pltpu.MemorySpace.SMEM)

    out = pl.pallas_call(
        functools.partial(_policy_kernel, out_size=out_size),
        out_shape=jax.ShapeDtypeStruct((b_pad, n_pad), jnp.float32),
        grid=grid,
        in_specs=[
            pl.BlockSpec((tb, in_size), lambda i: (i, 0)),   # x, pipelined over batch
            resident(fp["w1"]),
            resident(fp["b1"]),
            smem_scalar,                                     # PReLU slope a1
            resident(fp["wcat"]),
            resident(fp["bcat"]),
            smem_scalar,                                     # PReLU slope amu
            resident(fp["wout"]),
            resident(fp["bout"]),
            resident(fp["arange"]),
        ],
        out_specs=pl.BlockSpec((tb, n_pad), lambda i: (i, 0)),
        compiler_params=pltpu.CompilerParams(
            dimension_semantics=("parallel",),       # megacore sharding on v7x
            vmem_limit_bytes=32 * 1024 * 1024,       # safe on v7x's 64 MiB VMEM
        ),
    )(xp, fp["w1"], fp["b1"], fp["a1"], fp["wcat"], fp["bcat"], fp["amu"],
      fp["wout"], fp["bout"], fp["arange"])

    mu = out[:B, :out_size]
    sigma = out[:B, out_size:2 * out_size]
    return mu, sigma


def init_params(key, input_size, output_size, action_range):
    """Deterministic synthetic parameters with the same shapes as the nn.Module."""
    ks = jax.random.split(key, 10)

    def lin(kw, kb, fan_in, fan_out):
        bound = 1.0 / jnp.sqrt(jnp.float32(fan_in))
        w = jax.random.uniform(kw, (fan_in, fan_out), jnp.float32, -bound, bound)
        b = jax.random.uniform(kb, (1, fan_out), jnp.float32, -bound, bound)
        return w, b

    w1, b1 = lin(ks[0], ks[1], input_size, H1)
    wmu1, bmu1 = lin(ks[2], ks[3], H1, H2)
    wmu2, bmu2 = lin(ks[4], ks[5], H2, output_size)
    wsg1, bsg1 = lin(ks[6], ks[7], H1, H2)
    wsg2, bsg2 = lin(ks[8], ks[9], H2, output_size)

    return {
        "w1": w1, "b1": b1,
        "a1": jnp.full((1, 1), 0.25, jnp.float32),    # PReLU default init
        "wmu1": wmu1, "bmu1": bmu1,
        "amu": jnp.full((1, 1), 0.25, jnp.float32),   # PReLU default init
        "wmu2": wmu2, "bmu2": bmu2,
        "wsg1": wsg1, "bsg1": bsg1,
        "wsg2": wsg2, "bsg2": bsg2,
        "action_range": jnp.asarray(action_range, jnp.float32).reshape(1, -1),
    }


def reference_forward(x, p):
    """Pure-JAX reference matching the PyTorch module exactly (unfused params)."""
    h = _prelu(x @ p["w1"] + p["b1"], p["a1"][0, 0])
    hmu = _prelu(h @ p["wmu1"] + p["bmu1"], p["amu"][0, 0])
    mu = jnp.tanh(hmu @ p["wmu2"] + p["bmu2"]) * p["action_range"]
    hsg = jnp.tanh(h @ p["wsg1"] + p["bsg1"])
    sigma = jnp.exp(hsg @ p["wsg2"] + p["bsg2"])
    return mu, sigma


# TODO(synk): update()/sample_action()/predict() involve the RMSprop optimizer,
# autograd and host-side numpy RNG — training-side code, not part of the
# forward pass, so not implemented as Pallas kernels.

if __name__ == "__main__":
    key = jax.random.PRNGKey(0)
    k_x, k_p, k_x2 = jax.random.split(key, 3)

    B, input_size, output_size = 8, 16, 4
    action_range = jnp.array([2.0, 1.0, 0.5, 3.0], jnp.float32)

    x = jax.random.normal(k_x, (B, input_size), jnp.float32)
    params = init_params(k_p, input_size, output_size, action_range)
    mu_ref, sigma_ref = reference_forward(x, params)

    # ---- f32 path (single grid step) --------------------------------------
    fp32 = fuse_params(params, output_size, jnp.float32)
    mu, sigma = policy_continuous_forward(x, fp32)
    jax.block_until_ready((mu, sigma))
    assert mu.shape == (B, output_size) and sigma.shape == (B, output_size)
    assert jnp.allclose(mu, mu_ref, atol=1e-5, rtol=1e-5)
    assert jnp.allclose(sigma, sigma_ref, atol=1e-5, rtol=1e-5)

    # ---- multi-tile parallel batch grid (exercises padding + pipelining) --
    B2 = 40
    x2 = jax.random.normal(k_x2, (B2, input_size), jnp.float32)
    mu2, sigma2 = policy_continuous_forward(x2, fp32, block_b=16)  # grid=(3,)
    jax.block_until_ready((mu2, sigma2))
    mu2_ref, sigma2_ref = reference_forward(x2, params)
    assert jnp.allclose(mu2, mu2_ref, atol=1e-5, rtol=1e-5)
    assert jnp.allclose(sigma2, sigma2_ref, atol=1e-5, rtol=1e-5)

    # ---- bf16 MXU-operand path (f32 accumulation / f32 elementwise) -------
    fpbf = fuse_params(params, output_size, jnp.bfloat16)
    mub, sigb = policy_continuous_forward(x, fpbf)
    jax.block_until_ready((mub, sigb))
    assert mub.shape == (B, output_size) and sigb.shape == (B, output_size)
    assert bool(jnp.all(jnp.isfinite(mub))) and bool(jnp.all(jnp.isfinite(sigb)))
    assert jnp.allclose(mub, mu_ref, atol=5e-2, rtol=5e-2)
    assert jnp.allclose(sigb, sigma_ref, atol=5e-2, rtol=5e-2)

    print("KERNEL_OK")
</pallas_src>

<mosaic_0001>
module attributes {stable_mosaic.version = 11 : i64} {
  func.func @_policy_kernel(%arg0: i32, %arg1: memref<8x16xf32, #tpu.memory_space<vmem>>, %arg2: memref<16x256xf32, #tpu.memory_space<vmem>>, %arg3: memref<1x256xf32, #tpu.memory_space<vmem>>, %arg4: memref<1x1xf32, #tpu.memory_space<smem>>, %arg5: memref<256x256xf32, #tpu.memory_space<vmem>>, %arg6: memref<1x256xf32, #tpu.memory_space<vmem>>, %arg7: memref<1x1xf32, #tpu.memory_space<smem>>, %arg8: memref<256x128xf32, #tpu.memory_space<vmem>>, %arg9: memref<1x128xf32, #tpu.memory_space<vmem>>, %arg10: memref<1x128xf32, #tpu.memory_space<vmem>>, %arg11: memref<8x128xf32, #tpu.memory_space<vmem>>) attributes {dimension_semantics = [#tpu.dimension_semantics<parallel>], iteration_bounds = array<i64: 1>, scalar_prefetch = 0 : i64, scratch_operands = 0 : i64, tpu.core_type = #tpu.core_type<tc>, window_params = [{transform_indices = @transform_0, window_bounds = array<i64: 8, 16>}, {pipeline_mode = #tpu.pipeline_mode<synchronous>, transform_indices = @transform_1, window_bounds = array<i64: 16, 256>}, {pipeline_mode = #tpu.pipeline_mode<synchronous>, transform_indices = @transform_2, window_bounds = array<i64: 1, 256>}, {transform_indices = @transform_3, window_bounds = array<i64: 1, 1>}, {pipeline_mode = #tpu.pipeline_mode<synchronous>, transform_indices = @transform_4, window_bounds = array<i64: 256, 256>}, {pipeline_mode = #tpu.pipeline_mode<synchronous>, transform_indices = @transform_5, window_bounds = array<i64: 1, 256>}, {transform_indices = @transform_6, window_bounds = array<i64: 1, 1>}, {pipeline_mode = #tpu.pipeline_mode<synchronous>, transform_indices = @transform_7, window_bounds = array<i64: 256, 128>}, {pipeline_mode = #tpu.pipeline_mode<synchronous>, transform_indices = @transform_8, window_bounds = array<i64: 1, 128>}, {pipeline_mode = #tpu.pipeline_mode<synchronous>, transform_indices = @transform_9, window_bounds = array<i64: 1, 128>}, {transform_indices = @transform_10, window_bounds = array<i64: 8, 128>}]} {
    %c0 = arith.constant 0 : index
    %c0_0 = arith.constant 0 : index
    %0 = vector.load %arg1[%c0, %c0_0] : memref<8x16xf32, #tpu.memory_space<vmem>>, vector<8x16xf32>
    %c0_1 = arith.constant 0 : index
    %c0_2 = arith.constant 0 : index
    %1 = vector.load %arg2[%c0_1, %c0_2] : memref<16x256xf32, #tpu.memory_space<vmem>>, vector<16x256xf32>
    %cst = arith.constant dense<0.000000e+00> : vector<8x256xf32>
    %2 = tpu.matmul %0, %1, %cst {dimension_numbers = #tpu.dot_dimension_numbers<[1], [0], [0], [1], [0, 0, 1, 1], [], []>} : vector<8x16xf32>, vector<16x256xf32>, vector<8x256xf32> -> vector<8x256xf32>
    %c0_3 = arith.constant 0 : index
    %c0_4 = arith.constant 0 : index
    %3 = vector.load %arg3[%c0_3, %c0_4] : memref<1x256xf32, #tpu.memory_space<vmem>>, vector<1x256xf32>
    %4 = vector.broadcast %3 : vector<1x256xf32> to vector<8x256xf32>
    %5 = arith.addf %2, %4 : vector<8x256xf32>
    %c0_5 = arith.constant 0 : index
    %c0_6 = arith.constant 0 : index
    %6 = memref.load %arg4[%c0_5, %c0_6] : memref<1x1xf32, #tpu.memory_space<smem>>
    %cst_7 = arith.constant 0.000000e+00 : f32
    %7 = vector.broadcast %cst_7 : f32 to vector<8x256xf32>
    %8 = arith.cmpf ogt, %5, %7 : vector<8x256xf32>
    %9 = vector.broadcast %6 : f32 to vector<8x256xf32>
    %10 = arith.mulf %9, %5 : vector<8x256xf32>
    %11 = arith.select %8, %5, %10 : vector<8x256xi1>, vector<8x256xf32>
    %c0_8 = arith.constant 0 : index
    %c0_9 = arith.constant 0 : index
    %12 = vector.load %arg5[%c0_8, %c0_9] : memref<256x256xf32, #tpu.memory_space<vmem>>, vector<256x256xf32>
    %cst_10 = arith.constant dense<0.000000e+00> : vector<8x256xf32>
    %13 = tpu.matmul %11, %12, %cst_10 {dimension_numbers = #tpu.dot_dimension_numbers<[1], [0], [0], [1], [0, 0, 1, 1], [], []>} : vector<8x256xf32>, vector<256x256xf32>, vector<8x256xf32> -> vector<8x256xf32>
    %c0_11 = arith.constant 0 : index
    %c0_12 = arith.constant 0 : index
    %14 = vector.load %arg6[%c0_11, %c0_12] : memref<1x256xf32, #tpu.memory_space<vmem>>, vector<1x256xf32>
    %15 = vector.broadcast %14 : vector<1x256xf32> to vector<8x256xf32>
    %16 = arith.addf %13, %15 : vector<8x256xf32>
    %17 = vector.extract_strided_slice %16 {offsets = [0, 0], sizes = [8, 128], strides = [1, 1]} : vector<8x256xf32> to vector<8x128xf32>
    %c0_13 = arith.constant 0 : index
    %c0_14 = arith.constant 0 : index
    %18 = memref.load %arg7[%c0_13, %c0_14] : memref<1x1xf32, #tpu.memory_space<smem>>
    %cst_15 = arith.constant 0.000000e+00 : f32
    %19 = vector.broadcast %cst_15 : f32 to vector<8x128xf32>
    %20 = arith.cmpf ogt, %17, %19 : vector<8x128xf32>
    %21 = vector.broadcast %18 : f32 to vector<8x128xf32>
    %22 = arith.mulf %21, %17 : vector<8x128xf32>
    %23 = arith.select %20, %17, %22 : vector<8x128xi1>, vector<8x128xf32>
    %24 = vector.extract_strided_slice %16 {offsets = [0, 128], sizes = [8, 128], strides = [1, 1]} : vector<8x256xf32> to vector<8x128xf32>
    %25 = math.tanh %24 : vector<8x128xf32>
    %26 = tpu.concatenate %23, %25 in 1 : vector<8x128xf32>, vector<8x128xf32> -> vector<8x256xf32>
    %c0_16 = arith.constant 0 : index
    %c0_17 = arith.constant 0 : index
    %27 = vector.load %arg8[%c0_16, %c0_17] : memref<256x128xf32, #tpu.memory_space<vmem>>, vector<256x128xf32>
    %cst_18 = arith.constant dense<0.000000e+00> : vector<8x128xf32>
    %28 = tpu.matmul %26, %27, %cst_18 {dimension_numbers = #tpu.dot_dimension_numbers<[1], [0], [0], [1], [0, 0, 1, 1], [], []>} : vector<8x256xf32>, vector<256x128xf32>, vector<8x128xf32> -> vector<8x128xf32>
    %c0_19 = arith.constant 0 : index
    %c0_20 = arith.constant 0 : index
    %29 = vector.load %arg9[%c0_19, %c0_20] : memref<1x128xf32, #tpu.memory_space<vmem>>, vector<1x128xf32>
    %30 = vector.broadcast %29 : vector<1x128xf32> to vector<8x128xf32>
    %31 = arith.addf %28, %30 : vector<8x128xf32>
    %32 = tpu.iota {dimensions = array<i32: 1>} : vector<8x128xi32>
    %c4_i32 = arith.constant 4 : i32
    %33 = vector.broadcast %c4_i32 : i32 to vector<8x128xi32>
    %34 = arith.cmpi slt, %32, %33 : vector<8x128xi32>
    %35 = math.tanh %31 : vector<8x128xf32>
    %c0_21 = arith.constant 0 : index
    %c0_22 = arith.constant 0 : index
    %36 = vector.load %arg10[%c0_21, %c0_22] : memref<1x128xf32, #tpu.memory_space<vmem>>, vector<1x128xf32>
    %37 = vector.broadcast %36 : vector<1x128xf32> to vector<8x128xf32>
    %38 = arith.mulf %35, %37 : vector<8x128xf32>
    %39 = math.exp %31 : vector<8x128xf32>
    %40 = arith.select %34, %38, %39 : vector<8x128xi1>, vector<8x128xf32>
    %c0_23 = arith.constant 0 : index
    %c0_24 = arith.constant 0 : index
    %41 = vector.load %arg11[%c0_23, %c0_24] : memref<8x128xf32, #tpu.memory_space<vmem>>, vector<8x128xf32>
    tpu.vector_store %arg11[%c0_23, %c0_24], %40 {strides = array<i32>} : memref<8x128xf32, #tpu.memory_space<vmem>>, vector<8x128xf32>,
    return
  }
  func.func @transform_0(%arg0: i32) -> (i32, i32) {
    %c0_i32 = arith.constant 0 : i32
    %c0_i32_0 = arith.constant 0 : i32
    return %arg0, %c0_i32 : i32, i32
  }
  func.func @transform_1(%arg0: i32) -> (i32, i32) {
    %c0_i32 = arith.constant 0 : i32
    %c0_i32_0 = arith.constant 0 : i32
    %c0_i32_1 = arith.constant 0 : i32
    return %c0_i32, %c0_i32_0 : i32, i32
  }
  func.func @transform_2(%arg0: i32) -> (i32, i32) {
    %c0_i32 = arith.constant 0 : i32
    %c0_i32_0 = arith.constant 0 : i32
    %c0_i32_1 = arith.constant 0 : i32
    return %c0_i32, %c0_i32_0 : i32, i32
  }
  func.func @transform_3(%arg0: i32) -> (i32, i32) {
    %c0_i32 = arith.constant 0 : i32
    %c0_i32_0 = arith.constant 0 : i32
    %c0_i32_1 = arith.constant 0 : i32
    return %c0_i32, %c0_i32_0 : i32, i32
  }
  func.func @transform_4(%arg0: i32) -> (i32, i32) {
    %c0_i32 = arith.constant 0 : i32
    %c0_i32_0 = arith.constant 0 : i32
    %c0_i32_1 = arith.constant 0 : i32
    return %c0_i32, %c0_i32_0 : i32, i32
  }
  func.func @transform_5(%arg0: i32) -> (i32, i32) {
    %c0_i32 = arith.constant 0 : i32
    %c0_i32_0 = arith.constant 0 : i32
    %c0_i32_1 = arith.constant 0 : i32
    return %c0_i32, %c0_i32_0 : i32, i32
  }
  func.func @transform_6(%arg0: i32) -> (i32, i32) {
    %c0_i32 = arith.constant 0 : i32
    %c0_i32_0 = arith.constant 0 : i32
    %c0_i32_1 = arith.constant 0 : i32
    return %c0_i32, %c0_i32_0 : i32, i32
  }
  func.func @transform_7(%arg0: i32) -> (i32, i32) {
    %c0_i32 = arith.constant 0 : i32
    %c0_i32_0 = arith.constant 0 : i32
    %c0_i32_1 = arith.constant 0 : i32
    return %c0_i32, %c0_i32_0 : i32, i32
  }
  func.func @transform_8(%arg0: i32) -> (i32, i32) {
    %c0_i32 = arith.constant 0 : i32
    %c0_i32_0 = arith.constant 0 : i32
    %c0_i32_1 = arith.constant 0 : i32
    return %c0_i32, %c0_i32_0 : i32, i32
  }
  func.func @transform_9(%arg0: i32) -> (i32, i32) {
    %c0_i32 = arith.constant 0 : i32
    %c0_i32_0 = arith.constant 0 : i32
    %c0_i32_1 = arith.constant 0 : i32
    return %c0_i32, %c0_i32_0 : i32, i32
  }
  func.func @transform_10(%arg0: i32) -> (i32, i32) {
    %c0_i32 = arith.constant 0 : i32
    %c0_i32_0 = arith.constant 0 : i32
    return %arg0, %c0_i32 : i32, i32
  }
}

</mosaic_0001>

<bundles_post_ra>
// kernel: tpu_custom_call.1
= control target key start
LH: loop header
LB: loop body
LE: loop exit
PB: predicated region body
PF: predicated region fallthrough
CT: control target
= control target key end

     0   :  { %17 = vsyncpa [#allocation5], 0  ;;  %s756_s0 = inlined_call_operand.hbm [shape: f32[8,16], index: 0, kind: input, shape index: {}]   ;;  %s757_s1 = inlined_call_operand.hbm [shape: f32[16,256], index: 1, kind: input, shape index: {}]   ;;  %s758_s2 = inlined_call_operand.vmem [shape: f32[1,256], index: 2, kind: input, shape index: {}]   ;;  %s759_s3 = inlined_call_operand.<no memory space> [shape: f32[1,1], index: 3, kind: input, shape index: {}]   ;;  %s760_s4 = inlined_call_operand.hbm [shape: f32[256,256], index: 4, kind: input, shape index: {}]   ;;  %s761_s5 = inlined_call_operand.vmem [shape: f32[1,256], index: 5, kind: input, shape index: {}]   ;;  %s762_s6 = inlined_call_operand.<no memory space> [shape: f32[1,1], index: 6, kind: input, shape index: {}]   ;;  %s763_s7 = inlined_call_operand.hbm [shape: f32[256,128], index: 7, kind: input, shape index: {}]   ;;  %s764_s8 = inlined_call_operand.vmem [shape: f32[1,128], index: 8, kind: input, shape index: {}]   ;;  %s765_s9 = inlined_call_operand.vmem [shape: f32[1,128], index: 9, kind: input, shape index: {}]   ;;  %s766_s10 = inlined_call_operand.hbm [shape: f32[8,128], index: 10, kind: output, shape index: {}]  }
   0x1   :  { %18 = vsyncpa [#allocation8], 0 }
   0x2   :  { %19 = vsyncpa [#allocation11], 0 }
   0x3   :  { %20 = vsyncpa [#allocation6], 0  ;;  %s648_s13 = smov [#allocation7]  }
   0x4   :  { %s36_s14 = sshll.u32 %s648_s13, 4  ;;  %s37_s14 = int_to_ptr.vmem [resolvable:$true] %s36_s14 }
   0x5   :  { %s548_s15 = scalar_lea.vmem %s37_s14, 512  ;;  %p553_p1 = scmp.lt.s32.totalorder %s37_s14, %s37_s14 }
   0x6   :  { %p549_p0 = scmp.ne.s32.totalorder %s37_s14, %s548_s15  ;;  %p554_p2 = scmp.lt.s32.totalorder %s548_s15, %s548_s15 }
   0x8   :  { %p555_p3 = por %p554_p2, %p553_p1 }
   0xa   :  { %p556_p4 = pnand %p555_p3, %p549_p0 }
   0xc   :  { %559 = shalt.err (!%p556_p4)
}
   0xd   :  { %s649_s16 = smov 256   ;;  %s650_s17 = smov 16  }
   0xe   :  { %42 = dma.hbm_to_vmem [thread:$0]  %s757_s1, 512, %s37_s14, [#allocation8], %s649_s16, %s649_s16, %s650_s17  }
   0xf   :  { %s651_s20 = smov [#allocation4]   ;;  %s652_s22 = smov [#allocation9]  }
  0x10   :  { %s27_s21 = sshll.u32 %s651_s20, 4  ;;  %s52_s23 = sshll.u32 %s652_s22, 4  ;;  %s28_s21 = int_to_ptr.vmem [resolvable:$true] %s27_s21  ;;  %s53_s23 = int_to_ptr.vmem [resolvable:$true] %s52_s23 }
  0x11   :  { %s568_s24 = scalar_lea.vmem %s28_s21, 128  ;;  %p573_p6 = scmp.lt.s32.totalorder %s28_s21, %s28_s21 }
  0x12   :  { %p569_p5 = scmp.ne.s32.totalorder %s28_s21, %s568_s24  ;;  %p574_p7 = scmp.lt.s32.totalorder %s568_s24, %s568_s24 }
  0x14   :  { %p575_p8 = por %p574_p7, %p573_p6 }
  0x16   :  { %p576_p9 = pnand %p575_p8, %p569_p5 }
  0x18   :  { %579 = shalt.err (!%p576_p9)
}
  0x19   :  { %30 = dma.hbm_to_vmem [thread:$0]  %s756_s0, 128, %s28_s21, [#allocation5]  }
  0x1a   :  { %s588_s27 = scalar_lea.vmem %s53_s23, 8192  ;;  %p593_p11 = scmp.lt.s32.totalorder %s53_s23, %s53_s23 }
  0x1b   :  { %p589_p10 = scmp.ne.s32.totalorder %s53_s23, %s588_s27  ;;  %p594_p12 = scmp.lt.s32.totalorder %s588_s27, %s588_s27 }
  0x1d   :  { %p595_p13 = por %p594_p12, %p593_p11 }
  0x1f   :  { %p596_p0 = pnand %p595_p13, %p589_p10 }
  0x21   :  { %599 = shalt.err (!%p596_p0)
}
  0x22   :  { %58 = dma.hbm_to_vmem [thread:$0]  %s760_s4, 8192, %s53_s23, [#allocation8], %s649_s16, %s649_s16, %s650_s17  }
  0x23   :  { %s653_s29 = smov [#allocation10]  }
  0x24   :  { %s68_s30 = sshll.u32 %s653_s29, 4  ;;  %s69_s30 = int_to_ptr.vmem [resolvable:$true] %s68_s30 }
  0x25   :  { %s608_s11 = scalar_lea.vmem %s69_s30, 4096  ;;  %p613_p2 = scmp.lt.s32.totalorder %s69_s30, %s69_s30 }
  0x26   :  { %p609_p1 = scmp.ne.s32.totalorder %s69_s30, %s608_s11  ;;  %p614_p3 = scmp.lt.s32.totalorder %s608_s11, %s608_s11 }
  0x28   :  { %p615_p4 = por %p614_p3, %p613_p2 }
  0x2a   :  { %p616_p5 = pnand %p615_p4, %p609_p1 }
  0x2c   :  { %619 = shalt.err (!%p616_p5)
}
  0x2d   :  { %s654_s0 = smov 128   ;;  %s655_s12 = smov 8  }
  0x2e   :  { %74 = dma.hbm_to_vmem [thread:$0]  %s763_s7, 4096, %s69_s30, [#allocation11], %s654_s0, %s654_s0, %s655_s12  }
  0x2f   :  { %640 = dma.done.wait [#allocation5], 128  }
  0x30   :  { %641 = vsyncadd [#allocation5], 4294967168 }
  0x31   :  { %642 = dma.done.wait [#allocation8], 8704  }
  0x32   :  { %643 = vsyncadd [#allocation8], 4294958592 }
  0x33   :  { %644 = dma.done.wait [#allocation11], 4096  }
  0x34   :  { %645 = vsyncadd [#allocation11], 4294963200  ;;  %v656_v0 = vmov 0.0   ;;  %v95_v1 = vld [vmem:[#allocation7 + $0x18] sm:$0xff]  ;;  %v94_v2 = vld [vmem:[#allocation7 + $0x10] sm:$0xff]  ;;  %vm108_vm0 = vcmask 130048  }
  0x35   :  { %176 = vmatprep.mubr.f32.mxu0 %v656_v0  ;;  %v93_v3 = vld [vmem:[#allocation7 + $0x8] sm:$0xff]  ;;  %140 = vmatprep.subr.mxu0 %v95_v1  ;;  %v92_v4 = vld [vmem:[#allocation7] sm:$0xff]  ;;  %v91_v5 = vld [vmem:[#allocation4] sm:$0xff]  ;;  %s657_s21 = smov [#allocation12]  }
  0x36   :  { %v222_v6 = vld [vmem:[#allocation9 + $0xf8] sm:$0xff]  ;;  %141 = vmatpush1.msra.mxu0 %v94_v2  ;;  %v221_v7 = vld [vmem:[#allocation9 + $0xf0] sm:$0xff]  ;;  %v220_v8 = vld [vmem:[#allocation9 + $0xe8] sm:$0xff]  ;;  %s475_s22 = sshll.u32 %s657_s21, 4  ;;  %s476_s22 = int_to_ptr.vmem [resolvable:$true] %s475_s22 }
  0x37   :  { %267 = vmatprep.subr.mxu1 %v222_v6  ;;  %v219_v9 = vld [vmem:[#allocation9 + $0xe0] sm:$0xff]  ;;  %142 = vmatprep.subr.mxu0 %v93_v3  ;;  %v218_v10 = vld [vmem:[#allocation9 + $0xd8] sm:$0xff]  ;;  %v217_v11 = vld [vmem:[#allocation9 + $0xd0] sm:$0xff]  ;;  %p625_p7 = scmp.lt.s32.totalorder %s476_s22, %s476_s22 }
  0x38   :  { %268 = vmatpush1.msra.mxu1 %v221_v7  ;;  %143 = vmatpush1.msra.mxu0 %v92_v4  ;;  %v216_v12 = vld [vmem:[#allocation9 + $0xc8] sm:$0xff]  ;;  %v215_v13 = vld [vmem:[#allocation9 + $0xc0] sm:$0xff]  ;;  %v214_v14 = vld [vmem:[#allocation9 + $0xb8] sm:$0xff] }
  0x39   :  { %269 = vmatprep.subr.mxu1 %v220_v8  ;;  %486 = vmatmul.mubr.msk.f32.vlgmr.msra.gmra.mxu0 %vm108_vm0, %v91_v5  ;;  %v213_v15 = vld [vmem:[#allocation9 + $0xb0] sm:$0xff]  ;;  %v212_v16 = vld [vmem:[#allocation9 + $0xa8] sm:$0xff]  ;;  %v211_v17 = vld [vmem:[#allocation9 + $0xa0] sm:$0xff] }
  0x3a   :  { %270 = vmatpush1.msra.mxu1 %v219_v9  ;;  %v210_v18 = vld [vmem:[#allocation9 + $0x98] sm:$0xff]  ;;  %v209_v19 = vld [vmem:[#allocation9 + $0x90] sm:$0xff]  ;;  %v208_v20 = vld [vmem:[#allocation9 + $0x88] sm:$0xff] }
  0x3b   :  { %271 = vmatprep.subr.mxu1 %v218_v10  ;;  %v207_v21 = vld [vmem:[#allocation9 + $0x80] sm:$0xff]  ;;  %v206_v22 = vld [vmem:[#allocation9 + $0x78] sm:$0xff]  ;;  %v205_v23 = vld [vmem:[#allocation9 + $0x70] sm:$0xff] }
  0x3c   :  { %272 = vmatpush1.msra.mxu1 %v217_v11  ;;  %v204_v24 = vld [vmem:[#allocation9 + $0x68] sm:$0xff]  ;;  %v203_v25 = vld [vmem:[#allocation9 + $0x60] sm:$0xff]  ;;  %v202_v26 = vld [vmem:[#allocation9 + $0x58] sm:$0xff] }
  0x3d   :  { %273 = vmatprep.subr.mxu1 %v216_v12  ;;  %v201_v27 = vld [vmem:[#allocation9 + $0x50] sm:$0xff]  ;;  %v200_v28 = vld [vmem:[#allocation9 + $0x48] sm:$0xff]  ;;  %v199_v29 = vld [vmem:[#allocation9 + $0x40] sm:$0xff] }
  0x3e   :  { %274 = vmatpush1.msra.mxu1 %v215_v13  ;;  %v198_v30 = vld [vmem:[#allocation9 + $0x38] sm:$0xff]  ;;  %v197_v31 = vld [vmem:[#allocation9 + $0x30] sm:$0xff]  ;;  %v196_v32 = vld [vmem:[#allocation9 + $0x28] sm:$0xff] }
  0x3f   :  { %275 = vmatprep.subr.mxu1 %v214_v14  ;;  %v195_v33 = vld [vmem:[#allocation9 + $0x20] sm:$0xff]  ;;  %v194_v34 = vld [vmem:[#allocation9 + $0x18] sm:$0xff]  ;;  %v193_v35 = vld [vmem:[#allocation9 + $0x10] sm:$0xff] }
  0x40   :  { %276 = vmatpush1.msra.mxu1 %v213_v15  ;;  %v192_v36 = vld [vmem:[#allocation9 + $0x8] sm:$0xff]  ;;  %v191_v37 = vld [vmem:[#allocation9] sm:$0xff]  ;;  %v254_v38 = vld [vmem:[#allocation9 + $0x1f8] sm:$0xff] }
  0x41   :  { %277 = vmatprep.subr.mxu1 %v212_v16  ;;  %v253_v39 = vld [vmem:[#allocation9 + $0x1f0] sm:$0xff]  ;;  %v252_v40 = vld [vmem:[#allocation9 + $0x1e8] sm:$0xff]  ;;  %v251_v41 = vld [vmem:[#allocation9 + $0x1e0] sm:$0xff] }
  0x42   :  { %278 = vmatpush1.msra.mxu1 %v211_v17  ;;  %v250_v42 = vld [vmem:[#allocation9 + $0x1d8] sm:$0xff]  ;;  %v249_v43 = vld [vmem:[#allocation9 + $0x1d0] sm:$0xff]  ;;  %v248_v44 = vld [vmem:[#allocation9 + $0x1c8] sm:$0xff] }
  0x43   :  { %279 = vmatprep.subr.mxu1 %v210_v18  ;;  %v247_v45 = vld [vmem:[#allocation9 + $0x1c0] sm:$0xff]  ;;  %v246_v46 = vld [vmem:[#allocation9 + $0x1b8] sm:$0xff]  ;;  %v245_v47 = vld [vmem:[#allocation9 + $0x1b0] sm:$0xff]  ;;  %v98_v18 = vlaneseq }
  0x44   :  { %280 = vmatpush1.msra.mxu1 %v209_v19  ;;  %v244_v48 = vld [vmem:[#allocation9 + $0x1a8] sm:$0xff]  ;;  %v243_v49 = vld [vmem:[#allocation9 + $0x1a0] sm:$0xff]  ;;  %v242_v50 = vld [vmem:[#allocation9 + $0x198] sm:$0xff] }
  0x45   :  { %281 = vmatprep.subr.mxu1 %v208_v20  ;;  %v241_v51 = vld [vmem:[#allocation9 + $0x190] sm:$0xff]  ;;  %v240_v52 = vld [vmem:[#allocation9 + $0x188] sm:$0xff]  ;;  %v239_v53 = vld [vmem:[#allocation9 + $0x180] sm:$0xff]  ;;  %v726_v19 = vshrl.u32 %v98_v18, 7 }
  0x46   :  { %282 = vmatpush1.msra.mxu1 %v207_v21  ;;  %v238_v54 = vld [vmem:[#allocation9 + $0x178] sm:$0xff]  ;;  %v237_v55 = vld [vmem:[#allocation9 + $0x170] sm:$0xff]  ;;  %v236_v56 = vld [vmem:[#allocation9 + $0x168] sm:$0xff] }
  0x47   :  { %283 = vmatprep.subr.mxu1 %v206_v22  ;;  %v235_v57 = vld [vmem:[#allocation9 + $0x160] sm:$0xff]  ;;  %v234_v58 = vld [vmem:[#allocation9 + $0x158] sm:$0xff]  ;;  %v233_v59 = vld [vmem:[#allocation9 + $0x150] sm:$0xff]  ;;  %v100_v20 = vsub.s32 0, %v726_v19  ;;  %v104_v22 = vsub.s32 1, %v726_v19 }
  0x48   :  { %284 = vmatpush1.msra.mxu1 %v205_v23  ;;  %v232_v60 = vld [vmem:[#allocation9 + $0x148] sm:$0xff]  ;;  %v231_v61 = vld [vmem:[#allocation9 + $0x140] sm:$0xff]  ;;  %v230_v62 = vld [vmem:[#allocation9 + $0x138] sm:$0xff] }
  0x49   :  { %285 = vmatprep.subr.mxu1 %v204_v24  ;;  %v229_v63 = vld [vmem:[#allocation9 + $0x130] sm:$0xff]  ;;  %v228_v0 = vld [vmem:[#allocation9 + $0x128] sm:$0xff]  ;;  %v227_v1 = vld [vmem:[#allocation9 + $0x120] sm:$0xff] }
  0x4a   :  { %286 = vmatpush1.msra.mxu1 %v203_v25  ;;  %v226_v2 = vld [vmem:[#allocation9 + $0x118] sm:$0xff]  ;;  %v225_v3 = vld [vmem:[#allocation9 + $0x110] sm:$0xff]  ;;  %v224_v4 = vld [vmem:[#allocation9 + $0x108] sm:$0xff] }
  0x4b   :  { %287 = vmatprep.subr.mxu1 %v202_v26  ;;  %v223_v5 = vld [vmem:[#allocation9 + $0x100] sm:$0xff]  ;;  %v375_v6 = vld [vmem:[#allocation10 + $0xf8] sm:$0xff]  ;;  %v374_v8 = vld [vmem:[#allocation10 + $0xf0] sm:$0xff] }
  0x4c   :  { %288 = vmatpush1.msra.mxu1 %v201_v27  ;;  %v359_v7 = vld [vmem:[#allocation10 + $0x78] sm:$0xff]  ;;  %489 = vmatprep.subr.mxu0 %v375_v6  ;;  %v358_v9 = vld [vmem:[#allocation10 + $0x70] sm:$0xff]  ;;  %v373_v10 = vld [vmem:[#allocation10 + $0xe8] sm:$0xff]  ;;  %v186_v27 = vstv %s759_s3 }
  0x4d   :  { %289 = vmatprep.subr.mxu1 %v200_v28  ;;  %490 = vmatpush3.msra.mxu0 %v359_v7  ;;  %v357_v11 = vld [vmem:[#allocation10 + $0x68] sm:$0xff]  ;;  %v372_v12 = vld [vmem:[#allocation10 + $0xe0] sm:$0xff]  ;;  %v371_v14 = vld [vmem:[#allocation10 + $0xd8] sm:$0xff]  ;;  %v454_v7 = vand.u32 127, %v98_v18 }
  0x4e   :  { %290 = vmatpush1.msra.mxu1 %v199_v29  ;;  %491 = vmatprep.subr.mxu0 %v374_v8  ;;  %v356_v13 = vld [vmem:[#allocation10 + $0x60] sm:$0xff]  ;;  %v355_v15 = vld [vmem:[#allocation10 + $0x58] sm:$0xff]  ;;  %v370_v16 = vld [vmem:[#allocation10 + $0xd0] sm:$0xff] }
  0x4f   :  { %291 = vmatprep.subr.mxu1 %v198_v30  ;;  %492 = vmatpush3.msra.mxu0 %v358_v9  ;;  %v354_v17 = vld [vmem:[#allocation10 + $0x50] sm:$0xff]  ;;  %v96_v21 = vld [vmem:[%s758_s2] sm:$0x3]  ;;  %vm455_vm4 = vcmp.lt.s32.totalorder %v454_v7, 4 }
  0x50   :  { %292 = vmatpush1.msra.mxu1 %v197_v31  ;;  %493 = vmatprep.subr.mxu0 %v373_v10  ;;  %v101_v23 = vrot.slane %v96_v21, %v100_v20  ;;  %v105_v24 = vrot.slane %v96_v21, %v104_v22  ;;  %v488_v8 = vld [vmem:[%s765_s9] ss:$0 sm:$0xff] }
  0x51   :  { %293 = vmatprep.subr.mxu1 %v196_v32  ;;  %494 = vmatpush3.msra.mxu0 %v357_v11 }
  0x52   :  { %294 = vmatpush1.msra.mxu1 %v195_v33  ;;  %495 = vmatprep.subr.mxu0 %v372_v12 }
  0x53   :  { %295 = vmatprep.subr.mxu1 %v194_v34  ;;  %496 = vmatpush3.msra.mxu0 %v356_v13  ;;  %v369_v34 = vld [vmem:[#allocation10 + $0xc8] sm:$0xff] }
  0x54   :  { %296 = vmatpush1.msra.mxu1 %v193_v35  ;;  %497 = vmatprep.subr.mxu0 %v371_v14  ;;  %v353_v35 = vld [vmem:[#allocation10 + $0x48] sm:$0xff] }
  0x55   :  { %297 = vmatprep.subr.mxu1 %v192_v36  ;;  %498 = vmatpush3.msra.mxu0 %v355_v15  ;;  %v368_v36 = vld [vmem:[#allocation10 + $0xc0] sm:$0xff] }
  0x56   :  { %298 = vmatpush1.msra.mxu1 %v191_v37  ;;  %499 = vmatprep.subr.mxu0 %v370_v16  ;;  %v352_v37 = vld [vmem:[#allocation10 + $0x40] sm:$0xff] }
  0x57   :  { %299 = vmatprep.subr.mxu1 %v254_v38  ;;  %500 = vmatpush3.msra.mxu0 %v354_v17  ;;  %v367_v38 = vld [vmem:[#allocation10 + $0xb8] sm:$0xff] }
  0x58   :  { %300 = vmatpush2.msra.mxu1 %v253_v39  ;;  %501 = vmatprep.subr.mxu0 %v369_v34  ;;  %v351_v39 = vld [vmem:[#allocation10 + $0x38] sm:$0xff] }
  0x59   :  { %301 = vmatprep.subr.mxu1 %v252_v40  ;;  %502 = vmatpush3.msra.mxu0 %v353_v35  ;;  %v366_v40 = vld [vmem:[#allocation10 + $0xb0] sm:$0xff] }
  0x5a   :  { %302 = vmatpush2.msra.mxu1 %v251_v41  ;;  %503 = vmatprep.subr.mxu0 %v368_v36  ;;  %v350_v41 = vld [vmem:[#allocation10 + $0x30] sm:$0xff] }
  0x5b   :  { %303 = vmatprep.subr.mxu1 %v250_v42  ;;  %504 = vmatpush3.msra.mxu0 %v352_v37  ;;  %v365_v42 = vld [vmem:[#allocation10 + $0xa8] sm:$0xff] }
  0x5c   :  { %304 = vmatpush2.msra.mxu1 %v249_v43  ;;  %505 = vmatprep.subr.mxu0 %v367_v38  ;;  %v349_v43 = vld [vmem:[#allocation10 + $0x28] sm:$0xff] }
  0x5d   :  { %305 = vmatprep.subr.mxu1 %v248_v44  ;;  %506 = vmatpush3.msra.mxu0 %v351_v39  ;;  %v364_v44 = vld [vmem:[#allocation10 + $0xa0] sm:$0xff] }
  0x5e   :  { %306 = vmatpush2.msra.mxu1 %v247_v45  ;;  %507 = vmatprep.subr.mxu0 %v366_v40  ;;  %v348_v45 = vld [vmem:[#allocation10 + $0x20] sm:$0xff] }
  0x5f   :  { %307 = vmatprep.subr.mxu1 %v246_v46  ;;  %508 = vmatpush3.msra.mxu0 %v350_v41  ;;  %v363_v46 = vld [vmem:[#allocation10 + $0x98] sm:$0xff] }
  0x60   :  { %308 = vmatpush2.msra.mxu1 %v245_v47  ;;  %509 = vmatprep.subr.mxu0 %v365_v42  ;;  %v347_v47 = vld [vmem:[#allocation10 + $0x18] sm:$0xff] }
  0x61   :  { %309 = vmatprep.subr.mxu1 %v244_v48  ;;  %510 = vmatpush3.msra.mxu0 %v349_v43  ;;  %v362_v48 = vld [vmem:[#allocation10 + $0x90] sm:$0xff] }
  0x62   :  { %310 = vmatpush2.msra.mxu1 %v243_v49  ;;  %511 = vmatprep.subr.mxu0 %v364_v44  ;;  %v346_v49 = vld [vmem:[#allocation10 + $0x10] sm:$0xff] }
  0x63   :  { %311 = vmatprep.subr.mxu1 %v242_v50  ;;  %512 = vmatpush3.msra.mxu0 %v348_v45  ;;  %v361_v50 = vld [vmem:[#allocation10 + $0x88] sm:$0xff] }
  0x64   :  { %312 = vmatpush2.msra.mxu1 %v241_v51  ;;  %513 = vmatprep.subr.mxu0 %v363_v46  ;;  %v345_v51 = vld [vmem:[#allocation10 + $0x8] sm:$0xff] }
  0x65   :  { %313 = vmatprep.subr.mxu1 %v240_v52  ;;  %514 = vmatpush3.msra.mxu0 %v347_v47  ;;  %v360_v52 = vld [vmem:[#allocation10 + $0x80] sm:$0xff] }
  0x66   :  { %314 = vmatpush2.msra.mxu1 %v239_v53  ;;  %515 = vmatprep.subr.mxu0 %v362_v48  ;;  %v344_v53 = vld [vmem:[#allocation10] sm:$0xff] }
  0x67   :  { %315 = vmatprep.subr.mxu1 %v238_v54  ;;  %516 = vmatpush3.msra.mxu0 %v346_v49  ;;  %v255_v54 = vld [vmem:[%s761_s5] sm:$0x3] }
  0x68   :  { %316 = vmatpush2.msra.mxu1 %v237_v55  ;;  %517 = vmatprep.subr.mxu0 %v361_v50  ;;  %v264_v55 = vrot.slane %v255_v54, %v104_v22 }
  0x69   :  { %317 = vmatprep.subr.mxu1 %v236_v56  ;;  %518 = vmatpush3.msra.mxu0 %v345_v51 }
  0x6a   :  { %318 = vmatpush2.msra.mxu1 %v235_v57  ;;  %519 = vmatprep.subr.mxu0 %v360_v52 }
  0x6b   :  { %319 = vmatprep.subr.mxu1 %v234_v58  ;;  %520 = vmatpush3.msra.mxu0 %v344_v53 }
  0x6c   :  { %320 = vmatpush2.msra.mxu1 %v233_v59  ;;  %v260_v59 = vrot.slane %v255_v54, %v100_v20 }
  0x6d   :  { %321 = vmatprep.subr.mxu1 %v232_v60 }
  0x6e   :  { %322 = vmatpush2.msra.mxu1 %v231_v61  ;;  %v340_v61 = vstv %s762_s6 }
  0x6f   :  { %323 = vmatprep.subr.mxu1 %v230_v62 }
  0x70   :  { %324 = vmatpush2.msra.mxu1 %v229_v63 }
  0x71   :  { %325 = vmatprep.subr.mxu1 %v228_v0 }
  0x72   :  { %326 = vmatpush2.msra.mxu1 %v227_v1 }
  0x73   :  { %327 = vmatprep.subr.mxu1 %v226_v2  ;;  %v487_v2 = vld [vmem:[%s764_s8] ss:$0 sm:$0xff]  ;;  %s620_s8 = scalar_lea.vmem %s476_s22, 128 }
  0x74   :  { %328 = vmatpush2.msra.mxu1 %v225_v3  ;;  %p621_p6 = scmp.ne.s32.totalorder %s476_s22, %s620_s8  ;;  %p626_p8 = scmp.lt.s32.totalorder %s620_s8, %s620_s8 }
  0x75   :  { %329 = vmatprep.subr.mxu1 %v224_v4 }
  0x76   :  { %330 = vmatpush2.msra.mxu1 %v223_v5  ;;  %p627_p9 = por %p626_p8, %p625_p7 }
  0x78   :  { %p628_p10 = pnand %p627_p9, %p621_p6 }
  0xf9   :  { %v178_v25 = vpop.f32.mrf.mxu0 }
  0xfa   :  { %v179_v26 = vadd.f32 %v178_v25, %v101_v23 }
  0xfb   :  { %v180_v28 = vpop.f32.mrf.mxu0 }
  0xfc   :  { %v181_v29 = vadd.f32 %v180_v28, %v105_v24  ;;  %v187_v30 = vmul.f32 %v186_v27, %v179_v26  ;;  %vm184_vm2 = vcmp.gt.f32.partialorder %v179_v26, 0.0 }
  0xfe   :  { %vm185_vm1 = vcmp.gt.f32.partialorder %v181_v29, 0.0  ;;  %v188_v31 = vmul.f32 %v186_v27, %v181_v29  ;;  %v189_v33 = vsel %vm184_vm2, %v179_v26, %v187_v30 }
 0x100   :  { %v190_v32 = vsel %vm185_vm1, %v181_v29, %v188_v31 }
 0x101   :  { %331 = vmatprep.mubr.f32.mxu1 %v190_v32 }
 0x102   :  { %332 = vmatmul.mubr.f32.vlgmr.msra.gmra.mxu1 %v189_v33 }
 0x1c2   :  { %v333_v56 = vpop.f32.mrf.mxu1 }
 0x1c3   :  { %v334_v60 = vadd.f32 %v333_v56, %v260_v59 }
 0x1c4   :  { %v335_v57 = vpop.f32.mrf.mxu1 }
 0x1c5   :  { %v336_v58 = vadd.f32 %v335_v57, %v264_v55  ;;  %v341_v62 = vmul.f32 %v340_v61, %v334_v60  ;;  %vm339_vm3 = vcmp.gt.f32.partialorder %v334_v60, 0.0 }
 0x1c7   :  { %534 = vtanh.f32 %v336_v58  ;;  %v342_v0 = vsel %vm339_vm3, %v334_v60, %v341_v62 }
 0x1d4   :  { %v535_v63 = vpop.eup %534 }
 0x1d5   :  { %447 = vmatprep.mubr.f32.mxu0 %v535_v63 }
 0x1d6   :  { %448 = vmatmul.mubr.f32.vlgmr.msra.gmra.mxu0 %v342_v0 }
 0x296   :  { %v521_v1 = vpop.f32.mrf.mxu0 }
 0x298   :  { %v522_v3 = vpop.f32.mrf.mxu0 }
 0x299   :  { %v523_v4 = vadd.f32 %v522_v3, %v521_v1 }
 0x29b   :  { %v450_v5 = vadd.f32 %v523_v4, %v487_v2 }
 0x29d   :  { %536 = vtanh.f32 %v450_v5  ;;  %v465_v6 = vmul.f32 1.442695, %v450_v5 }
 0x29f   :  { %538 = vpow2.f32 %v465_v6 }
 0x2aa   :  { %v537_v9 = vpop.eup %536 }
 0x2ab   :  { %v464_v10 = vmul.f32 %v537_v9, %v488_v8 }
 0x2ac   :  { %v539_v11 = vpop.eup %538 }
 0x2ad   :  { %v467_v12 = vsel %vm455_vm4, %v464_v10, %v539_v11 }
 0x2ae   :  { %468 = vst [vmem:[#allocation12] sm:$0xff] %v467_v12 }
 0x2af   :  { %631 = shalt.err (!%p628_p10)
}
 0x2b0   :  { %478 = dma.vmem_to_hbm [thread:$0]  %s476_s22, 128, %s766_s10, [#allocation6]  }
 0x2b1   :  { %646 = dma.done.wait [#allocation6], 128  }
 0x2b2   :  { %647 = vsyncadd [#allocation6], 4294967168 }
 0x2b3   :  { %482 = vsyncpa [#allocation5], 1 }
 0x2b4   :  { %483 = vsyncpa [#allocation8], 1 }
 0x2b5   :  { %484 = vsyncpa [#allocation11], 1 }
 0x2b6   :  { %485 = vsyncpa [#allocation6], 1 }

</bundles_post_ra>
